<compile_context>
chip_gen: v7x
topology: tpu7x:2x2x1
jax: 0.10.0
libtpu: 0.0.40
codegen_flags: <defaults>
</compile_context>

<pallas_src>
import jax
import jax.numpy as jnp
from jax.experimental import pallas as pl
from jax.experimental.pallas import tpu as pltpu


def cnn_kernel(p_ref, w1d_ref, b1d_ref, w2_ref, b2_ref, o_ref, *, n):
    # p_ref  : (M_blk, K)   unfolded conv-1 patches, batch folded into rows
    # w1d_ref: (K, 2n)      conv1 weight duplicated along out-channels: [w1 | w1]
    # b1d_ref: (1, 2n)      [b1 | b1]
    # w2_ref : (2n, sub)    conv2 (1x1) weight, channels-last
    # b2_ref : (1, sub)
    # o_ref  : (M_blk, sub)
    pre = (jnp.dot(p_ref[...], w1d_ref[...], preferred_element_type=jnp.float32)
           + b1d_ref[...])                                   # (M, 2n)
    h_all = jax.nn.sigmoid(pre)                              # cols [0,n) == cols [n,2n)
    # cat([h, h**2], channel dim) without concatenate: square only the second half.
    col = jax.lax.broadcasted_iota(jnp.int32, h_all.shape, 1)
    h2 = jnp.where(col >= n, h_all * h_all, h_all)           # (M, 2n)
    # single fused 1x1-conv matmul against the full (2n, sub) weight
    y = (jnp.dot(h2, w2_ref[...], preferred_element_type=jnp.float32)
         + b2_ref[...])                                      # (M, sub)
    o_ref[...] = jax.nn.sigmoid(y)


def cnn_forward(x, w1, b1, w2, b2, *, n, sub_length, padding):
    """x: (B, 1, L) float32. Returns (B, 1, L_out * sub_length)."""
    B, C, L = x.shape
    assert C == 1
    K = sub_length + 2 * padding
    L_out = (L - K) // sub_length + 1
    M = B * L_out

    # glue: unfold strided conv windows, batch folded into rows -> (B*L_out, K)
    xs = x[:, 0, :]
    idx = sub_length * jnp.arange(L_out)[:, None] + jnp.arange(K)[None, :]
    patches = xs[:, idx].reshape(M, K)

    # duplicate conv1 params along out-channels so the kernel can build [h, h^2]
    # in-register and run one fused dot against the full w2.
    w1d = jnp.concatenate([w1, w1], axis=1)                  # (K, 2n)
    b1d = jnp.concatenate([b1, b1]).reshape(1, 2 * n)        # (1, 2n)
    b2_2d = b2.reshape(1, sub_length)                        # (1, sub)

    # Single block for small problems; tile rows only once M is large (keeps the
    # block inside v7x's smaller VMEM while staying near HBM roofline).
    block_m = M if M <= 1024 else 1024
    grid_m = pl.cdiv(M, block_m)
    sem = ("parallel",) if grid_m > 1 else ("arbitrary",)

    kernel = lambda *refs: cnn_kernel(*refs, n=n)

    out = pl.pallas_call(
        kernel,
        out_shape=jax.ShapeDtypeStruct((M, sub_length), jnp.float32),
        grid_spec=pltpu.PrefetchScalarGridSpec(
            num_scalar_prefetch=0,
            grid=(grid_m,),
            in_specs=[
                pl.BlockSpec((block_m, K), lambda i: (i, 0)),
                pl.BlockSpec((K, 2 * n), lambda i: (0, 0)),
                pl.BlockSpec((1, 2 * n), lambda i: (0, 0)),
                pl.BlockSpec((2 * n, sub_length), lambda i: (0, 0)),
                pl.BlockSpec((1, sub_length), lambda i: (0, 0)),
            ],
            out_specs=pl.BlockSpec((block_m, sub_length), lambda i: (i, 0)),
        ),
        compiler_params=pltpu.CompilerParams(dimension_semantics=sem),
    )(patches, w1d, b1d, w2, b2_2d)

    # (B*L_out, sub_length) row-major == torch's transpose(1,2).reshape order.
    return out.reshape(B, 1, L_out * sub_length)


def cnn_forward_ref(x, w1, b1, w2, b2, *, n, sub_length, padding):
    """Pure-JAX reference of the torch forward (channels-last internally)."""
    B, _, L = x.shape
    K = sub_length + 2 * padding
    L_out = (L - K) // sub_length + 1
    xs = x[:, 0, :]
    idx = sub_length * jnp.arange(L_out)[:, None] + jnp.arange(K)[None, :]
    patches = xs[:, idx]                                     # (B, L_out, K)
    h = jax.nn.sigmoid(patches @ w1 + b1)                    # (B, L_out, n)
    h2 = jnp.concatenate([h, h * h], axis=-1)                # (B, L_out, 2n)
    y = jax.nn.sigmoid(h2 @ w2 + b2)                         # (B, L_out, sub)
    return y.reshape(B, 1, -1)


if __name__ == "__main__":
    # module hyper-parameters
    n = 8
    sub_length = 8
    padding = 2
    K = sub_length + 2 * padding          # conv1 kernel size = 12
    L_out = 8
    L = L_out * sub_length + 2 * padding  # 68
    B = 2

    key = jax.random.PRNGKey(0)
    kx, k1, k2, k3, k4 = jax.random.split(key, 5)

    # deterministic synthetic parameters (shapes follow nn.Conv1d in __init__)
    # conv1.weight (n, 1, K) -> stored channels-last as (K, n)
    w1 = jax.random.normal(k1, (K, n), dtype=jnp.float32) * 0.3
    b1 = jax.random.normal(k2, (n,), dtype=jnp.float32) * 0.1
    # conv2.weight (sub_length, 2n, 1) -> stored channels-last as (2n, sub_length)
    w2 = jax.random.normal(k3, (2 * n, sub_length), dtype=jnp.float32) * 0.3
    b2 = jax.random.normal(k4, (sub_length,), dtype=jnp.float32) * 0.1

    x = jax.random.normal(kx, (B, 1, L), dtype=jnp.float32)

    out = cnn_forward(x, w1, b1, w2, b2, n=n, sub_length=sub_length, padding=padding)
    out = jax.block_until_ready(out)

    ref = cnn_forward_ref(x, w1, b1, w2, b2, n=n, sub_length=sub_length, padding=padding)
    assert out.shape == (B, 1, L_out * sub_length), out.shape
    assert jnp.allclose(out, ref, atol=1e-5, rtol=1e-5), "mismatch vs reference"

    print("KERNEL_OK")
</pallas_src>

<mosaic_0001>
module attributes {stable_mosaic.version = 11 : i64} {
  func.func @_lambda_(%arg0: i32, %arg1: memref<16x12xf32, #tpu.memory_space<vmem>>, %arg2: memref<12x16xf32, #tpu.memory_space<vmem>>, %arg3: memref<1x16xf32, #tpu.memory_space<vmem>>, %arg4: memref<16x8xf32, #tpu.memory_space<vmem>>, %arg5: memref<1x8xf32, #tpu.memory_space<vmem>>, %arg6: memref<16x8xf32, #tpu.memory_space<vmem>>) attributes {dimension_semantics = [#tpu.dimension_semantics<arbitrary>], iteration_bounds = array<i64: 1>, scalar_prefetch = 0 : i64, scratch_operands = 0 : i64, tpu.core_type = #tpu.core_type<tc>, window_params = [{transform_indices = @transform_0, window_bounds = array<i64: 16, 12>}, {pipeline_mode = #tpu.pipeline_mode<synchronous>, transform_indices = @transform_1, window_bounds = array<i64: 12, 16>}, {pipeline_mode = #tpu.pipeline_mode<synchronous>, transform_indices = @transform_2, window_bounds = array<i64: 1, 16>}, {pipeline_mode = #tpu.pipeline_mode<synchronous>, transform_indices = @transform_3, window_bounds = array<i64: 16, 8>}, {pipeline_mode = #tpu.pipeline_mode<synchronous>, transform_indices = @transform_4, window_bounds = array<i64: 1, 8>}, {transform_indices = @transform_5, window_bounds = array<i64: 16, 8>}]} {
    %c0 = arith.constant 0 : index
    %c0_0 = arith.constant 0 : index
    %0 = vector.load %arg1[%c0, %c0_0] : memref<16x12xf32, #tpu.memory_space<vmem>>, vector<16x12xf32>
    %c0_1 = arith.constant 0 : index
    %c0_2 = arith.constant 0 : index
    %1 = vector.load %arg2[%c0_1, %c0_2] : memref<12x16xf32, #tpu.memory_space<vmem>>, vector<12x16xf32>
    %cst = arith.constant dense<0.000000e+00> : vector<16x16xf32>
    %2 = tpu.matmul %0, %1, %cst {dimension_numbers = #tpu.dot_dimension_numbers<[1], [0], [0], [1], [0, 0, 1, 1], [], []>} : vector<16x12xf32>, vector<12x16xf32>, vector<16x16xf32> -> vector<16x16xf32>
    %c0_3 = arith.constant 0 : index
    %c0_4 = arith.constant 0 : index
    %3 = vector.load %arg3[%c0_3, %c0_4] : memref<1x16xf32, #tpu.memory_space<vmem>>, vector<1x16xf32>
    %4 = vector.broadcast %3 : vector<1x16xf32> to vector<16x16xf32>
    %5 = arith.addf %2, %4 : vector<16x16xf32>
    %6 = arith.negf %5 : vector<16x16xf32>
    %7 = math.exp %6 : vector<16x16xf32>
    %cst_5 = arith.constant 1.000000e+00 : f32
    %8 = vector.broadcast %cst_5 : f32 to vector<16x16xf32>
    %9 = arith.addf %8, %7 : vector<16x16xf32>
    %10 = arith.divf %8, %9 : vector<16x16xf32>
    %11 = tpu.iota {dimensions = array<i32: 1>} : vector<16x16xi32>
    %c8_i32 = arith.constant 8 : i32
    %12 = vector.broadcast %c8_i32 : i32 to vector<16x16xi32>
    %13 = arith.cmpi sge, %11, %12 : vector<16x16xi32>
    %14 = arith.mulf %10, %10 : vector<16x16xf32>
    %15 = arith.select %13, %14, %10 : vector<16x16xi1>, vector<16x16xf32>
    %c0_6 = arith.constant 0 : index
    %c0_7 = arith.constant 0 : index
    %16 = vector.load %arg4[%c0_6, %c0_7] : memref<16x8xf32, #tpu.memory_space<vmem>>, vector<16x8xf32>
    %cst_8 = arith.constant dense<0.000000e+00> : vector<16x8xf32>
    %17 = tpu.matmul %15, %16, %cst_8 {dimension_numbers = #tpu.dot_dimension_numbers<[1], [0], [0], [1], [0, 0, 1, 1], [], []>} : vector<16x16xf32>, vector<16x8xf32>, vector<16x8xf32> -> vector<16x8xf32>
    %c0_9 = arith.constant 0 : index
    %c0_10 = arith.constant 0 : index
    %18 = vector.load %arg5[%c0_9, %c0_10] : memref<1x8xf32, #tpu.memory_space<vmem>>, vector<1x8xf32>
    %19 = vector.broadcast %18 : vector<1x8xf32> to vector<16x8xf32>
    %20 = arith.addf %17, %19 : vector<16x8xf32>
    %21 = arith.negf %20 : vector<16x8xf32>
    %22 = math.exp %21 : vector<16x8xf32>
    %cst_11 = arith.constant 1.000000e+00 : f32
    %23 = vector.broadcast %cst_11 : f32 to vector<16x8xf32>
    %24 = arith.addf %23, %22 : vector<16x8xf32>
    %25 = arith.divf %23, %24 : vector<16x8xf32>
    %c0_12 = arith.constant 0 : index
    %c0_13 = arith.constant 0 : index
    %26 = vector.load %arg6[%c0_12, %c0_13] : memref<16x8xf32, #tpu.memory_space<vmem>>, vector<16x8xf32>
    tpu.vector_store %arg6[%c0_12, %c0_13], %25 {strides = array<i32>} : memref<16x8xf32, #tpu.memory_space<vmem>>, vector<16x8xf32>,
    return
  }
  func.func @transform_0(%arg0: i32) -> (i32, i32) {
    %c0_i32 = arith.constant 0 : i32
    %c0_i32_0 = arith.constant 0 : i32
    return %arg0, %c0_i32 : i32, i32
  }
  func.func @transform_1(%arg0: i32) -> (i32, i32) {
    %c0_i32 = arith.constant 0 : i32
    %c0_i32_0 = arith.constant 0 : i32
    %c0_i32_1 = arith.constant 0 : i32
    return %c0_i32, %c0_i32_0 : i32, i32
  }
  func.func @transform_2(%arg0: i32) -> (i32, i32) {
    %c0_i32 = arith.constant 0 : i32
    %c0_i32_0 = arith.constant 0 : i32
    %c0_i32_1 = arith.constant 0 : i32
    return %c0_i32, %c0_i32_0 : i32, i32
  }
  func.func @transform_3(%arg0: i32) -> (i32, i32) {
    %c0_i32 = arith.constant 0 : i32
    %c0_i32_0 = arith.constant 0 : i32
    %c0_i32_1 = arith.constant 0 : i32
    return %c0_i32, %c0_i32_0 : i32, i32
  }
  func.func @transform_4(%arg0: i32) -> (i32, i32) {
    %c0_i32 = arith.constant 0 : i32
    %c0_i32_0 = arith.constant 0 : i32
    %c0_i32_1 = arith.constant 0 : i32
    return %c0_i32, %c0_i32_0 : i32, i32
  }
  func.func @transform_5(%arg0: i32) -> (i32, i32) {
    %c0_i32 = arith.constant 0 : i32
    %c0_i32_0 = arith.constant 0 : i32
    return %arg0, %c0_i32 : i32, i32
  }
}

</mosaic_0001>

<bundles_post_ra>
// kernel: tpu_custom_call.1
= control target key start
LH: loop header
LB: loop body
LE: loop exit
PB: predicated region body
PF: predicated region fallthrough
CT: control target
= control target key end

     0   :  { %10 = vsyncpa [#allocation3], 0  ;;  %s348_s18 = smov [#allocation2]   ;;  %s418_s0 = inlined_call_operand.vmem [shape: f32[16,12], index: 0, kind: input, shape index: {}]   ;;  %s419_s1 = inlined_call_operand.hbm [shape: f32[12,16], index: 1, kind: input, shape index: {}]   ;;  %s420_s2 = inlined_call_operand.vmem [shape: f32[1,16], index: 2, kind: input, shape index: {}]   ;;  %s421_s3 = inlined_call_operand.vmem [shape: f32[16,8], index: 3, kind: input, shape index: {}]   ;;  %s422_s4 = inlined_call_operand.vmem [shape: f32[1,8], index: 4, kind: input, shape index: {}]   ;;  %s423_s5 = inlined_call_operand.vmem [shape: f32[16,8], index: 5, kind: output, shape index: {}]  }
   0x1   :  { %s18_s19 = sshll.u32 %s348_s18, 4  ;;  %s324_s22 = scalar_lea.hbm %s419_s1, 256  ;;  %s19_s19 = int_to_ptr.vmem [resolvable:$true] %s18_s19 }
   0x2   :  { %p325_p0 = scmp.ne.s32.totalorder %s419_s1, %s324_s22  ;;  %p328_p1 = scmp.lt.u32.totalorder %s324_s22, %s419_s1 }
   0x4   :  { %p330_p2 = pnand %p328_p1, %p325_p0 }
   0x6   :  { %333 = shalt.err (!%p330_p2)
}
   0x7   :  { %s334_s27 = scalar_lea.vmem %s19_s19, 256  ;;  %p339_p4 = scmp.lt.s32.totalorder %s19_s19, %s19_s19 }
   0x8   :  { %p335_p3 = scmp.ne.s32.totalorder %s19_s19, %s334_s27  ;;  %p340_p5 = scmp.lt.s32.totalorder %s334_s27, %s334_s27 }
   0xa   :  { %p341_p6 = por %p340_p5, %p339_p4 }
   0xc   :  { %p342_p7 = pnand %p341_p6, %p335_p3 }
   0xe   :  { %345 = shalt.err (!%p342_p7)
}
   0xf   :  { %s349_s28 = smov 128   ;;  %s350_s29 = smov 8  }
  0x10   :  { %24 = dma.hbm_to_vmem [thread:$0]  %s419_s1, 256, %s19_s19, [#allocation3], %s349_s28, %s349_s28, %s350_s29  }
  0x11   :  { %346 = dma.done.wait [#allocation3], 256  }
  0x12   :  { %347 = vsyncadd [#allocation3], 4294967040  ;;  %vm52_vm0 = vcmask 1043456   ;;  %vm45_vm1 = vcmask 97280   ;;  %vm351_vm2 = vmmov 1   ;;  %v36_v0 = vld [vmem:[#allocation2] sm:$0xff]  ;;  %v143_v19 = vlaneseq }
  0x13   :  { %vm295_vm3 = vmpackc.low %vm52_vm0, %vm351_vm2  ;;  %v37_v1 = vld [vmem:[#allocation2 + $0x8] sm:$0xf]  ;;  %v34_v2 = vld [vmem:[%s418_s0] sm:$0xff]  ;;  %vm159_vm5 = vcmask 130048   ;;  %vm253_vm6 = vcmask 64512  }
  0x14   :  { %v294_v3 = vpack.c.bf16 %v37_v1, %v36_v0  ;;  %284 = vmatprep.mubr.msk.f32.mxu0 %vm45_vm1, %v34_v2  ;;  %v35_v4 = vld [vmem:[%s418_s0 + $0x8] sm:$0xff]  ;;  %v150_v5 = vld [vmem:[%s421_s3] sm:$0xff]  ;;  %v144_v20 = vand.u32 127, %v143_v19 }
  0x15   :  { %v151_v6 = vld [vmem:[%s421_s3 + $0x8] sm:$0xff]  ;;  %v261_v8 = vld [vmem:[%s420_s2] ss:$0 sm:$0xff] }
  0x16   :  { %296 = vmatprep.subr.msk.bf16.mxu0 %vm295_vm3, %v294_v3  ;;  %v300_v7 = vpack.c.bf16 %v151_v6, %v150_v5  ;;  %vm145_vm4 = vcmp.ge.s32.totalorder %v144_v20, 8  ;;  %v267_v27 = vld [vmem:[%s422_s4] ss:$0 sm:$0xff] }
  0x17   :  { %299 = vmatpush3.bf16.msk.msra.mxu0 %vm295_vm3, %v294_v3 }
  0x18   :  { %301 = vmatprep.subr.bf16.mxu1 %v300_v7 }
  0x19   :  { %303 = vmatpush3.bf16.msra.mxu1 %v300_v7 }
  0x1a   :  { %285 = vmatmul.mubr.msk.f32.vlgmr.msra.gmra.mrb[0].mxu0 %vm45_vm1, %v35_v4 }
  0xed   :  { %v286_v9 = vpop.f32.mrb[0].mxu0 }
  0xee   :  { %v128_v10 = vadd.f32 %v286_v9, %v261_v8  ;;  %v122_v11 = vpop.f32.mrb[1].mxu0 }
  0xef   :  { %v123_v12 = vadd.f32 %v261_v8, %v122_v11 }
  0xf0   :  { %v266_v13 = vmul.f32 -1.442695, %v128_v10 }
  0xf1   :  { %v265_v14 = vmul.f32 -1.442695, %v123_v12 }
  0xf2   :  { %308 = vpow2.f32 %v266_v13 }
  0xf3   :  { %310 = vpow2.f32 %v265_v14 }
  0xfc   :  { %v309_v15 = vpop.eup %308 }
  0xfd   :  { %v311_v16 = vpop.eup %310  ;;  %v138_v17 = vadd.f32 1.0, %v309_v15 }
  0xfe   :  { %v137_v18 = vadd.f32 1.0, %v311_v16 }
  0xff   :  { %312 = vrcp.f32 %v138_v17 }
 0x100   :  { %314 = vrcp.f32 %v137_v18 }
 0x109   :  { %v313_v21 = vpop.eup %312 }
 0x10a   :  { %v315_v22 = vpop.eup %314  ;;  %v147_v23 = vmul.f32 %v313_v21, %v313_v21 }
 0x10b   :  { %v146_v24 = vmul.f32 %v315_v22, %v315_v22 }
 0x10c   :  { %v149_v26 = vsel %vm145_vm4, %v147_v23, %v313_v21 }
 0x10d   :  { %v148_v25 = vsel %vm145_vm4, %v146_v24, %v315_v22 }
 0x10e   :  { %291 = vmatprep.mubr.msk.f32.mxu1 %vm159_vm5, %v148_v25 }
 0x10f   :  { %292 = vmatmul.mubr.msk.f32.vlgmr.msra.gmra.mrb[0].mxu1 %vm159_vm5, %v149_v26 }
 0x1e2   :  { %v293_v28 = vpop.f32.mrb[0].mxu1 }
 0x1e3   :  { %v238_v29 = vadd.f32 %v293_v28, %v267_v27  ;;  %v232_v30 = vpop.f32.mrb[1].mxu1 }
 0x1e4   :  { %v233_v31 = vadd.f32 %v267_v27, %v232_v30 }
 0x1e5   :  { %v271_v32 = vmul.f32 -1.442695, %v238_v29 }
 0x1e6   :  { %v270_v33 = vmul.f32 -1.442695, %v233_v31 }
 0x1e7   :  { %316 = vpow2.f32 %v271_v32 }
 0x1e8   :  { %318 = vpow2.f32 %v270_v33 }
 0x1f1   :  { %v317_v34 = vpop.eup %316 }
 0x1f2   :  { %v319_v35 = vpop.eup %318  ;;  %v248_v36 = vadd.f32 1.0, %v317_v34 }
 0x1f3   :  { %v247_v37 = vadd.f32 1.0, %v319_v35 }
 0x1f4   :  { %320 = vrcp.f32 %v248_v36 }
 0x1f5   :  { %322 = vrcp.f32 %v247_v37 }
 0x1fe   :  { %v321_v38 = vpop.eup %320 }
 0x1ff   :  { %v323_v39 = vpop.eup %322  ;;  %255 = vst.msk [vmem:[%s423_s5 + $0x8] sm:$0xff] %vm253_vm6, %v321_v38 }
 0x200   :  { %254 = vst.msk [vmem:[%s423_s5] sm:$0xff] %vm253_vm6, %v323_v39 }
 0x201   :  { %260 = vsyncpa [#allocation3], 1 }

</bundles_post_ra>
